<compile_context>
chip_gen: v7x
topology: tpu7x:2x2x1
jax: 0.10.0
libtpu: 0.0.40
codegen_flags: <defaults>
</compile_context>

<pallas_src>
import jax
import jax.numpy as jnp
from jax.experimental import pallas as pl
from jax.experimental.pallas import tpu as pltpu


def _decoder_kernel(emb_ref, latent_ref, wl_ref, bl_ref,
                    wih_ref, whh_ref, bias_ref, bhn_ref,
                    out_ref, gx_scr, h_scr):
    B, S, E = emb_ref.shape          # S here is the per-tile slice of the GRU batch axis
    Hp = h_scr.shape[-1]             # padded hidden width (multiple of 128)

    # de_hidden = latent2output(tanh(en_latent))            -> (B, E)
    de = jnp.tanh(latent_ref[...])
    de = jnp.dot(de, wl_ref[...], preferred_element_type=jnp.float32) + bl_ref[...]

    # Hoisted input-to-hidden gates: one big (B*S, E) x (E, 3*Hp) matmul.
    # (emb + de) @ Wih == emb @ Wih + de @ Wih, so the broadcast latent term
    # folds in without materializing output_embedding in VMEM.
    gx = jnp.dot(emb_ref[...].reshape(B * S, E), wih_ref[...],
                 preferred_element_type=jnp.float32).reshape(B, S, 3 * Hp)
    de_gx = jnp.dot(de, wih_ref[...], preferred_element_type=jnp.float32)   # (B, 3*Hp)
    # bias_ref holds bih_{r,z,n} with bhh_{r,z} already folded in.
    gx_scr[...] = gx + de_gx[:, None, :] + bias_ref[...]

    # Loop-invariant reads, hoisted out of the recurrence.
    whh = whh_ref[...]               # (Hp, 3*Hp) fused recurrent weights
    bhn = bhn_ref[...]               # (1, Hp)    b_hn (must stay inside r*(...))

    h_scr[...] = jnp.zeros_like(h_scr)    # hidden=None -> zero initial state

    def step(t, carry):
        h = h_scr[...]                                            # (S, Hp)
        g = gx_scr[t]                                             # (S, 3*Hp)
        gh = jnp.dot(h, whh, preferred_element_type=jnp.float32)  # one fused MXU push
        r = jax.nn.sigmoid(g[:, 0 * Hp:1 * Hp] + gh[:, 0 * Hp:1 * Hp])
        z = jax.nn.sigmoid(g[:, 1 * Hp:2 * Hp] + gh[:, 1 * Hp:2 * Hp])
        n = jnp.tanh(g[:, 2 * Hp:3 * Hp] + r * (gh[:, 2 * Hp:3 * Hp] + bhn))
        h_new = (1.0 - z) * n + z * h
        h_scr[...] = h_new
        out_ref[t] = h_new                    # lane-dense (S, 128) store
        return carry

    # T = B is small & static -> full unroll; only the true h dependency serializes.
    jax.lax.fori_loop(0, B, step, 0, unroll=True)


def _round_up(x, m):
    return (x + m - 1) // m * m


def _pick_tile(s):
    # largest power-of-two tile (<= 512) dividing S; falls back to S itself.
    for t in (512, 256, 128, 64, 32, 16, 8):
        if s % t == 0:
            return t
    return s


def _pack_gru_params(params, H, Hp):
    """Fuse [r, z, n] gate weights/biases into lane-dense 128-padded blocks."""
    E = params["wih"].shape[1]
    wih = jnp.zeros((E, 3 * Hp), jnp.float32)
    whh = jnp.zeros((Hp, 3 * Hp), jnp.float32)
    bias = jnp.zeros((1, 3 * Hp), jnp.float32)
    bhn = jnp.zeros((1, Hp), jnp.float32)
    for g in range(3):
        wih = wih.at[:, g * Hp:g * Hp + H].set(params["wih"][g])
        whh = whh.at[:H, g * Hp:g * Hp + H].set(params["whh"][g])
    # bhh_r / bhh_z fold into the precomputed input-gate bias;
    # bhh_n cannot (it sits inside r * (h @ Whh_n + bhh_n)).
    bias = bias.at[:, 0 * Hp:0 * Hp + H].set(params["bih"][0] + params["bhh"][0])
    bias = bias.at[:, 1 * Hp:1 * Hp + H].set(params["bih"][1] + params["bhh"][1])
    bias = bias.at[:, 2 * Hp:2 * Hp + H].set(params["bih"][2])
    bhn = bhn.at[:, :H].set(params["bhh"][2])
    return wih, whh, bias, bhn


def decoder_forward(x, en_latent, params):
    # Glue: embedding gather stays in JAX.
    # TODO(synk): nn.Dropout is identity at inference time; no mask applied here.
    emb = jnp.take(params["embedding"], x, axis=0)               # (B, S, E) f32
    B, S, E = emb.shape
    H = params["whh"].shape[-1]
    L = en_latent.shape[-1]
    Hp = _round_up(H, 128)
    tile_s = _pick_tile(S)

    wih, whh, bias, bhn = _pack_gru_params(params, H, Hp)

    def full(shape):
        return pl.BlockSpec(shape, lambda s: tuple(0 for _ in shape))

    grid_spec = pltpu.PrefetchScalarGridSpec(
        num_scalar_prefetch=0,
        grid=(S // tile_s,),
        in_specs=[
            pl.BlockSpec((B, tile_s, E), lambda s: (0, s, 0)),   # embeddings
            full((B, L)),                                        # en_latent
            full((L, E)), full((1, E)),                          # latent2output W, b
            full((E, 3 * Hp)), full((Hp, 3 * Hp)),               # fused GRU weights
            full((1, 3 * Hp)), full((1, Hp)),                    # fused biases
        ],
        out_specs=pl.BlockSpec((B, tile_s, Hp), lambda s: (0, s, 0)),
        scratch_shapes=[
            pltpu.VMEM((B, tile_s, 3 * Hp), jnp.float32),   # precomputed input gates
            pltpu.VMEM((tile_s, Hp), jnp.float32),          # GRU hidden state
        ],
    )

    out_padded = pl.pallas_call(
        _decoder_kernel,
        out_shape=jax.ShapeDtypeStruct((B, S, Hp), jnp.float32),
        grid_spec=grid_spec,
        compiler_params=pltpu.CompilerParams(
            dimension_semantics=("parallel",)),
    )(emb, en_latent.astype(jnp.float32), params["wl"], params["bl"],
      wih, whh, bias, bhn)

    return out_padded[:, :, :H]


def decoder_reference(x, en_latent, params):
    # Pure-JAX reference for correctness check (unfused weights).
    emb = jnp.take(params["embedding"], x, axis=0)
    de = jnp.tanh(en_latent) @ params["wl"] + params["bl"]
    xs = emb + de[:, None, :]
    S, H = xs.shape[1], params["whh"].shape[-1]
    h = jnp.zeros((S, H), jnp.float32)
    outs = []
    for t in range(xs.shape[0]):
        xt = xs[t]
        r = jax.nn.sigmoid(xt @ params["wih"][0] + params["bih"][0]
                           + h @ params["whh"][0] + params["bhh"][0])
        z = jax.nn.sigmoid(xt @ params["wih"][1] + params["bih"][1]
                           + h @ params["whh"][1] + params["bhh"][1])
        n = jnp.tanh(xt @ params["wih"][2] + params["bih"][2]
                     + r * (h @ params["whh"][2] + params["bhh"][2]))
        h = (1.0 - z) * n + z * h
        outs.append(h)
    return jnp.stack(outs, axis=0)


def init_params(key, vocab, embed, latent, hidden):
    ks = jax.random.split(key, 8)
    s = 0.1
    return {
        "embedding": jax.random.normal(ks[0], (vocab, embed), jnp.float32) * s,
        "wl":  jax.random.normal(ks[1], (latent, embed), jnp.float32) * s,   # latent2output weight^T
        "bl":  jax.random.normal(ks[2], (1, embed), jnp.float32) * s,
        # GRU gate weights, order [r, z, n], stored already transposed for x @ W
        "wih": jax.random.normal(ks[3], (3, hidden, hidden), jnp.float32) * s,
        "whh": jax.random.normal(ks[4], (3, hidden, hidden), jnp.float32) * s,
        "bih": jax.random.normal(ks[5], (3, 1, hidden), jnp.float32) * s,
        "bhh": jax.random.normal(ks[6], (3, 1, hidden), jnp.float32) * s,
    }


if __name__ == "__main__":
    B, S = 4, 8          # batch of token sequences
    VOCAB = 50
    EMBED = HIDDEN = 32  # embedding_size == hidden_size (required by the module)
    LATENT = 16

    key = jax.random.PRNGKey(0)
    k_x, k_l, k_p = jax.random.split(key, 3)
    x = jax.random.randint(k_x, (B, S), 0, VOCAB, dtype=jnp.int32)
    en_latent = jax.random.normal(k_l, (B, LATENT), jnp.float32)
    params = init_params(k_p, VOCAB, EMBED, LATENT, HIDDEN)

    out = decoder_forward(x, en_latent, params)
    out = jax.block_until_ready(out)

    ref = decoder_reference(x, en_latent, params)
    assert out.shape == (B, S, HIDDEN), out.shape
    assert jnp.allclose(out, ref, atol=1e-4, rtol=1e-4), \
        float(jnp.max(jnp.abs(out - ref)))

    print("KERNEL_OK")
</pallas_src>

<mosaic_0001>
module attributes {stable_mosaic.version = 11 : i64} {
  func.func @_decoder_kernel(%arg0: i32, %arg1: memref<4x8x32xf32, #tpu.memory_space<vmem>>, %arg2: memref<4x16xf32, #tpu.memory_space<vmem>>, %arg3: memref<16x32xf32, #tpu.memory_space<vmem>>, %arg4: memref<1x32xf32, #tpu.memory_space<vmem>>, %arg5: memref<32x384xf32, #tpu.memory_space<vmem>>, %arg6: memref<128x384xf32, #tpu.memory_space<vmem>>, %arg7: memref<1x384xf32, #tpu.memory_space<vmem>>, %arg8: memref<1x128xf32, #tpu.memory_space<vmem>>, %arg9: memref<4x8x128xf32, #tpu.memory_space<vmem>>, %arg10: memref<4x8x384xf32, #tpu.memory_space<vmem>>, %arg11: memref<8x128xf32, #tpu.memory_space<vmem>>) attributes {dimension_semantics = [#tpu.dimension_semantics<parallel>], iteration_bounds = array<i64: 1>, scalar_prefetch = 0 : i64, scratch_operands = 2 : i64, tpu.core_type = #tpu.core_type<tc>, window_params = [{transform_indices = @transform_0, window_bounds = array<i64: 4, 8, 32>}, {pipeline_mode = #tpu.pipeline_mode<synchronous>, transform_indices = @transform_1, window_bounds = array<i64: 4, 16>}, {pipeline_mode = #tpu.pipeline_mode<synchronous>, transform_indices = @transform_2, window_bounds = array<i64: 16, 32>}, {pipeline_mode = #tpu.pipeline_mode<synchronous>, transform_indices = @transform_3, window_bounds = array<i64: 1, 32>}, {pipeline_mode = #tpu.pipeline_mode<synchronous>, transform_indices = @transform_4, window_bounds = array<i64: 32, 384>}, {pipeline_mode = #tpu.pipeline_mode<synchronous>, transform_indices = @transform_5, window_bounds = array<i64: 128, 384>}, {pipeline_mode = #tpu.pipeline_mode<synchronous>, transform_indices = @transform_6, window_bounds = array<i64: 1, 384>}, {pipeline_mode = #tpu.pipeline_mode<synchronous>, transform_indices = @transform_7, window_bounds = array<i64: 1, 128>}, {transform_indices = @transform_8, window_bounds = array<i64: 4, 8, 128>}]} {
    %c0 = arith.constant 0 : index
    %c0_0 = arith.constant 0 : index
    %0 = vector.load %arg2[%c0, %c0_0] : memref<4x16xf32, #tpu.memory_space<vmem>>, vector<4x16xf32>
    %1 = math.tanh %0 : vector<4x16xf32>
    %c0_1 = arith.constant 0 : index
    %c0_2 = arith.constant 0 : index
    %2 = vector.load %arg3[%c0_1, %c0_2] : memref<16x32xf32, #tpu.memory_space<vmem>>, vector<16x32xf32>
    %cst = arith.constant dense<0.000000e+00> : vector<4x32xf32>
    %3 = tpu.matmul %1, %2, %cst {dimension_numbers = #tpu.dot_dimension_numbers<[1], [0], [0], [1], [0, 0, 1, 1], [], []>} : vector<4x16xf32>, vector<16x32xf32>, vector<4x32xf32> -> vector<4x32xf32>
    %c0_3 = arith.constant 0 : index
    %c0_4 = arith.constant 0 : index
    %4 = vector.load %arg4[%c0_3, %c0_4] : memref<1x32xf32, #tpu.memory_space<vmem>>, vector<1x32xf32>
    %5 = vector.broadcast %4 : vector<1x32xf32> to vector<4x32xf32>
    %6 = arith.addf %3, %5 : vector<4x32xf32>
    %c0_5 = arith.constant 0 : index
    %c0_6 = arith.constant 0 : index
    %c0_7 = arith.constant 0 : index
    %7 = vector.load %arg1[%c0_5, %c0_6, %c0_7] : memref<4x8x32xf32, #tpu.memory_space<vmem>>, vector<4x8x32xf32>
    %8 = vector.shape_cast %7 : vector<4x8x32xf32> to vector<32x32xf32>
    %c0_8 = arith.constant 0 : index
    %c0_9 = arith.constant 0 : index
    %9 = vector.load %arg5[%c0_8, %c0_9] : memref<32x384xf32, #tpu.memory_space<vmem>>, vector<32x384xf32>
    %cst_10 = arith.constant dense<0.000000e+00> : vector<32x384xf32>
    %10 = tpu.matmul %8, %9, %cst_10 {dimension_numbers = #tpu.dot_dimension_numbers<[1], [0], [0], [1], [0, 0, 1, 1], [], []>} : vector<32x32xf32>, vector<32x384xf32>, vector<32x384xf32> -> vector<32x384xf32>
    %11 = vector.shape_cast %10 : vector<32x384xf32> to vector<4x8x384xf32>
    %c0_11 = arith.constant 0 : index
    %c0_12 = arith.constant 0 : index
    %12 = vector.load %arg5[%c0_11, %c0_12] : memref<32x384xf32, #tpu.memory_space<vmem>>, vector<32x384xf32>
    %cst_13 = arith.constant dense<0.000000e+00> : vector<4x384xf32>
    %13 = tpu.matmul %6, %12, %cst_13 {dimension_numbers = #tpu.dot_dimension_numbers<[1], [0], [0], [1], [0, 0, 1, 1], [], []>} : vector<4x32xf32>, vector<32x384xf32>, vector<4x384xf32> -> vector<4x384xf32>
    %14 = vector.shape_cast %13 : vector<4x384xf32> to vector<4x1x384xf32>
    %15 = vector.broadcast %14 : vector<4x1x384xf32> to vector<4x8x384xf32>
    %16 = arith.addf %11, %15 : vector<4x8x384xf32>
    %c0_14 = arith.constant 0 : index
    %c0_15 = arith.constant 0 : index
    %17 = vector.load %arg7[%c0_14, %c0_15] : memref<1x384xf32, #tpu.memory_space<vmem>>, vector<1x384xf32>
    %18 = vector.shape_cast %17 : vector<1x384xf32> to vector<1x1x384xf32>
    %19 = vector.broadcast %18 : vector<1x1x384xf32> to vector<4x8x384xf32>
    %20 = arith.addf %16, %19 : vector<4x8x384xf32>
    %c0_16 = arith.constant 0 : index
    %c0_17 = arith.constant 0 : index
    %c0_18 = arith.constant 0 : index
    %21 = vector.load %arg10[%c0_16, %c0_17, %c0_18] : memref<4x8x384xf32, #tpu.memory_space<vmem>>, vector<4x8x384xf32>
    tpu.vector_store %arg10[%c0_16, %c0_17, %c0_18], %20 {strides = array<i32>} : memref<4x8x384xf32, #tpu.memory_space<vmem>>, vector<4x8x384xf32>,
    %c0_19 = arith.constant 0 : index
    %c0_20 = arith.constant 0 : index
    %22 = vector.load %arg6[%c0_19, %c0_20] : memref<128x384xf32, #tpu.memory_space<vmem>>, vector<128x384xf32>
    %c0_21 = arith.constant 0 : index
    %c0_22 = arith.constant 0 : index
    %23 = vector.load %arg8[%c0_21, %c0_22] : memref<1x128xf32, #tpu.memory_space<vmem>>, vector<1x128xf32>
    %cst_23 = arith.constant 0.000000e+00 : f32
    %24 = vector.broadcast %cst_23 : f32 to vector<8x128xf32>
    %c0_24 = arith.constant 0 : index
    %c0_25 = arith.constant 0 : index
    %25 = vector.load %arg11[%c0_24, %c0_25] : memref<8x128xf32, #tpu.memory_space<vmem>>, vector<8x128xf32>
    tpu.vector_store %arg11[%c0_24, %c0_25], %24 {strides = array<i32>} : memref<8x128xf32, #tpu.memory_space<vmem>>, vector<8x128xf32>,
    %c0_i32 = arith.constant 0 : i32
    %c0_26 = arith.constant 0 : index
    %c0_27 = arith.constant 0 : index
    %26 = vector.load %arg11[%c0_26, %c0_27] : memref<8x128xf32, #tpu.memory_space<vmem>>, vector<8x128xf32>
    %27 = arith.index_cast %c0_i32 : i32 to index
    %c0_28 = arith.constant 0 : index
    %c0_29 = arith.constant 0 : index
    %28 = vector.load %arg10[%27, %c0_28, %c0_29] : memref<4x8x384xf32, #tpu.memory_space<vmem>>, vector<1x8x384xf32>
    %29 = vector.shape_cast %28 : vector<1x8x384xf32> to vector<8x384xf32>
    %cst_30 = arith.constant dense<0.000000e+00> : vector<8x384xf32>
    %30 = tpu.matmul %26, %22, %cst_30 {dimension_numbers = #tpu.dot_dimension_numbers<[1], [0], [0], [1], [0, 0, 1, 1], [], []>} : vector<8x128xf32>, vector<128x384xf32>, vector<8x384xf32> -> vector<8x384xf32>
    %31 = vector.extract_strided_slice %29 {offsets = [0, 0], sizes = [8, 128], strides = [1, 1]} : vector<8x384xf32> to vector<8x128xf32>
    %32 = vector.extract_strided_slice %30 {offsets = [0, 0], sizes = [8, 128], strides = [1, 1]} : vector<8x384xf32> to vector<8x128xf32>
    %33 = arith.addf %31, %32 : vector<8x128xf32>
    %34 = arith.negf %33 : vector<8x128xf32>
    %35 = math.exp %34 : vector<8x128xf32>
    %cst_31 = arith.constant 1.000000e+00 : f32
    %36 = vector.broadcast %cst_31 : f32 to vector<8x128xf32>
    %37 = arith.addf %36, %35 : vector<8x128xf32>
    %38 = arith.divf %36, %37 : vector<8x128xf32>
    %39 = vector.extract_strided_slice %29 {offsets = [0, 128], sizes = [8, 128], strides = [1, 1]} : vector<8x384xf32> to vector<8x128xf32>
    %40 = vector.extract_strided_slice %30 {offsets = [0, 128], sizes = [8, 128], strides = [1, 1]} : vector<8x384xf32> to vector<8x128xf32>
    %41 = arith.addf %39, %40 : vector<8x128xf32>
    %42 = arith.negf %41 : vector<8x128xf32>
    %43 = math.exp %42 : vector<8x128xf32>
    %cst_32 = arith.constant 1.000000e+00 : f32
    %44 = vector.broadcast %cst_32 : f32 to vector<8x128xf32>
    %45 = arith.addf %44, %43 : vector<8x128xf32>
    %46 = arith.divf %44, %45 : vector<8x128xf32>
    %47 = vector.extract_strided_slice %29 {offsets = [0, 256], sizes = [8, 128], strides = [1, 1]} : vector<8x384xf32> to vector<8x128xf32>
    %48 = vector.extract_strided_slice %30 {offsets = [0, 256], sizes = [8, 128], strides = [1, 1]} : vector<8x384xf32> to vector<8x128xf32>
    %49 = vector.broadcast %23 : vector<1x128xf32> to vector<8x128xf32>
    %50 = arith.addf %48, %49 : vector<8x128xf32>
    %51 = arith.mulf %38, %50 : vector<8x128xf32>
    %52 = arith.addf %47, %51 : vector<8x128xf32>
    %53 = math.tanh %52 : vector<8x128xf32>
    %cst_33 = arith.constant 1.000000e+00 : f32
    %54 = vector.broadcast %cst_33 : f32 to vector<8x128xf32>
    %55 = arith.subf %54, %46 : vector<8x128xf32>
    %56 = arith.mulf %55, %53 : vector<8x128xf32>
    %57 = arith.mulf %46, %26 : vector<8x128xf32>
    %58 = arith.addf %56, %57 : vector<8x128xf32>
    %c0_34 = arith.constant 0 : index
    %c0_35 = arith.constant 0 : index
    %59 = vector.load %arg11[%c0_34, %c0_35] : memref<8x128xf32, #tpu.memory_space<vmem>>, vector<8x128xf32>
    tpu.vector_store %arg11[%c0_34, %c0_35], %58 {strides = array<i32>} : memref<8x128xf32, #tpu.memory_space<vmem>>, vector<8x128xf32>,
    %60 = arith.index_cast %c0_i32 : i32 to index
    %c0_36 = arith.constant 0 : index
    %c0_37 = arith.constant 0 : index
    %61 = vector.load %arg9[%60, %c0_36, %c0_37] : memref<4x8x128xf32, #tpu.memory_space<vmem>>, vector<1x8x128xf32>
    %62 = vector.shape_cast %61 : vector<1x8x128xf32> to vector<8x128xf32>
    %63 = vector.shape_cast %58 : vector<8x128xf32> to vector<1x8x128xf32>
    tpu.vector_store %arg9[%60, %c0_36, %c0_37], %63 {strides = array<i32>} : memref<4x8x128xf32, #tpu.memory_space<vmem>>, vector<1x8x128xf32>,
    %c1_i32 = arith.constant 1 : i32
    %c0_38 = arith.constant 0 : index
    %c0_39 = arith.constant 0 : index
    %64 = vector.load %arg11[%c0_38, %c0_39] : memref<8x128xf32, #tpu.memory_space<vmem>>, vector<8x128xf32>
    %65 = arith.index_cast %c1_i32 : i32 to index
    %c0_40 = arith.constant 0 : index
    %c0_41 = arith.constant 0 : index
    %66 = vector.load %arg10[%65, %c0_40, %c0_41] : memref<4x8x384xf32, #tpu.memory_space<vmem>>, vector<1x8x384xf32>
    %67 = vector.shape_cast %66 : vector<1x8x384xf32> to vector<8x384xf32>
    %cst_42 = arith.constant dense<0.000000e+00> : vector<8x384xf32>
    %68 = tpu.matmul %64, %22, %cst_42 {dimension_numbers = #tpu.dot_dimension_numbers<[1], [0], [0], [1], [0, 0, 1, 1], [], []>} : vector<8x128xf32>, vector<128x384xf32>, vector<8x384xf32> -> vector<8x384xf32>
    %69 = vector.extract_strided_slice %67 {offsets = [0, 0], sizes = [8, 128], strides = [1, 1]} : vector<8x384xf32> to vector<8x128xf32>
    %70 = vector.extract_strided_slice %68 {offsets = [0, 0], sizes = [8, 128], strides = [1, 1]} : vector<8x384xf32> to vector<8x128xf32>
    %71 = arith.addf %69, %70 : vector<8x128xf32>
    %72 = arith.negf %71 : vector<8x128xf32>
    %73 = math.exp %72 : vector<8x128xf32>
    %cst_43 = arith.constant 1.000000e+00 : f32
    %74 = vector.broadcast %cst_43 : f32 to vector<8x128xf32>
    %75 = arith.addf %74, %73 : vector<8x128xf32>
    %76 = arith.divf %74, %75 : vector<8x128xf32>
    %77 = vector.extract_strided_slice %67 {offsets = [0, 128], sizes = [8, 128], strides = [1, 1]} : vector<8x384xf32> to vector<8x128xf32>
    %78 = vector.extract_strided_slice %68 {offsets = [0, 128], sizes = [8, 128], strides = [1, 1]} : vector<8x384xf32> to vector<8x128xf32>
    %79 = arith.addf %77, %78 : vector<8x128xf32>
    %80 = arith.negf %79 : vector<8x128xf32>
    %81 = math.exp %80 : vector<8x128xf32>
    %cst_44 = arith.constant 1.000000e+00 : f32
    %82 = vector.broadcast %cst_44 : f32 to vector<8x128xf32>
    %83 = arith.addf %82, %81 : vector<8x128xf32>
    %84 = arith.divf %82, %83 : vector<8x128xf32>
    %85 = vector.extract_strided_slice %67 {offsets = [0, 256], sizes = [8, 128], strides = [1, 1]} : vector<8x384xf32> to vector<8x128xf32>
    %86 = vector.extract_strided_slice %68 {offsets = [0, 256], sizes = [8, 128], strides = [1, 1]} : vector<8x384xf32> to vector<8x128xf32>
    %87 = vector.broadcast %23 : vector<1x128xf32> to vector<8x128xf32>
    %88 = arith.addf %86, %87 : vector<8x128xf32>
    %89 = arith.mulf %76, %88 : vector<8x128xf32>
    %90 = arith.addf %85, %89 : vector<8x128xf32>
    %91 = math.tanh %90 : vector<8x128xf32>
    %cst_45 = arith.constant 1.000000e+00 : f32
    %92 = vector.broadcast %cst_45 : f32 to vector<8x128xf32>
    %93 = arith.subf %92, %84 : vector<8x128xf32>
    %94 = arith.mulf %93, %91 : vector<8x128xf32>
    %95 = arith.mulf %84, %64 : vector<8x128xf32>
    %96 = arith.addf %94, %95 : vector<8x128xf32>
    %c0_46 = arith.constant 0 : index
    %c0_47 = arith.constant 0 : index
    %97 = vector.load %arg11[%c0_46, %c0_47] : memref<8x128xf32, #tpu.memory_space<vmem>>, vector<8x128xf32>
    tpu.vector_store %arg11[%c0_46, %c0_47], %96 {strides = array<i32>} : memref<8x128xf32, #tpu.memory_space<vmem>>, vector<8x128xf32>,
    %98 = arith.index_cast %c1_i32 : i32 to index
    %c0_48 = arith.constant 0 : index
    %c0_49 = arith.constant 0 : index
    %99 = vector.load %arg9[%98, %c0_48, %c0_49] : memref<4x8x128xf32, #tpu.memory_space<vmem>>, vector<1x8x128xf32>
    %100 = vector.shape_cast %99 : vector<1x8x128xf32> to vector<8x128xf32>
    %101 = vector.shape_cast %96 : vector<8x128xf32> to vector<1x8x128xf32>
    tpu.vector_store %arg9[%98, %c0_48, %c0_49], %101 {strides = array<i32>} : memref<4x8x128xf32, #tpu.memory_space<vmem>>, vector<1x8x128xf32>,
    %c2_i32 = arith.constant 2 : i32
    %c0_50 = arith.constant 0 : index
    %c0_51 = arith.constant 0 : index
    %102 = vector.load %arg11[%c0_50, %c0_51] : memref<8x128xf32, #tpu.memory_space<vmem>>, vector<8x128xf32>
    %103 = arith.index_cast %c2_i32 : i32 to index
    %c0_52 = arith.constant 0 : index
    %c0_53 = arith.constant 0 : index
    %104 = vector.load %arg10[%103, %c0_52, %c0_53] : memref<4x8x384xf32, #tpu.memory_space<vmem>>, vector<1x8x384xf32>
    %105 = vector.shape_cast %104 : vector<1x8x384xf32> to vector<8x384xf32>
    %cst_54 = arith.constant dense<0.000000e+00> : vector<8x384xf32>
    %106 = tpu.matmul %102, %22, %cst_54 {dimension_numbers = #tpu.dot_dimension_numbers<[1], [0], [0], [1], [0, 0, 1, 1], [], []>} : vector<8x128xf32>, vector<128x384xf32>, vector<8x384xf32> -> vector<8x384xf32>
    %107 = vector.extract_strided_slice %105 {offsets = [0, 0], sizes = [8, 128], strides = [1, 1]} : vector<8x384xf32> to vector<8x128xf32>
    %108 = vector.extract_strided_slice %106 {offsets = [0, 0], sizes = [8, 128], strides = [1, 1]} : vector<8x384xf32> to vector<8x128xf32>
    %109 = arith.addf %107, %108 : vector<8x128xf32>
    %110 = arith.negf %109 : vector<8x128xf32>
    %111 = math.exp %110 : vector<8x128xf32>
    %cst_55 = arith.constant 1.000000e+00 : f32
    %112 = vector.broadcast %cst_55 : f32 to vector<8x128xf32>
    %113 = arith.addf %112, %111 : vector<8x128xf32>
    %114 = arith.divf %112, %113 : vector<8x128xf32>
    %115 = vector.extract_strided_slice %105 {offsets = [0, 128], sizes = [8, 128], strides = [1, 1]} : vector<8x384xf32> to vector<8x128xf32>
    %116 = vector.extract_strided_slice %106 {offsets = [0, 128], sizes = [8, 128], strides = [1, 1]} : vector<8x384xf32> to vector<8x128xf32>
    %117 = arith.addf %115, %116 : vector<8x128xf32>
    %118 = arith.negf %117 : vector<8x128xf32>
    %119 = math.exp %118 : vector<8x128xf32>
    %cst_56 = arith.constant 1.000000e+00 : f32
    %120 = vector.broadcast %cst_56 : f32 to vector<8x128xf32>
    %121 = arith.addf %120, %119 : vector<8x128xf32>
    %122 = arith.divf %120, %121 : vector<8x128xf32>
    %123 = vector.extract_strided_slice %105 {offsets = [0, 256], sizes = [8, 128], strides = [1, 1]} : vector<8x384xf32> to vector<8x128xf32>
    %124 = vector.extract_strided_slice %106 {offsets = [0, 256], sizes = [8, 128], strides = [1, 1]} : vector<8x384xf32> to vector<8x128xf32>
    %125 = vector.broadcast %23 : vector<1x128xf32> to vector<8x128xf32>
    %126 = arith.addf %124, %125 : vector<8x128xf32>
    %127 = arith.mulf %114, %126 : vector<8x128xf32>
    %128 = arith.addf %123, %127 : vector<8x128xf32>
    %129 = math.tanh %128 : vector<8x128xf32>
    %cst_57 = arith.constant 1.000000e+00 : f32
    %130 = vector.broadcast %cst_57 : f32 to vector<8x128xf32>
    %131 = arith.subf %130, %122 : vector<8x128xf32>
    %132 = arith.mulf %131, %129 : vector<8x128xf32>
    %133 = arith.mulf %122, %102 : vector<8x128xf32>
    %134 = arith.addf %132, %133 : vector<8x128xf32>
    %c0_58 = arith.constant 0 : index
    %c0_59 = arith.constant 0 : index
    %135 = vector.load %arg11[%c0_58, %c0_59] : memref<8x128xf32, #tpu.memory_space<vmem>>, vector<8x128xf32>
    tpu.vector_store %arg11[%c0_58, %c0_59], %134 {strides = array<i32>} : memref<8x128xf32, #tpu.memory_space<vmem>>, vector<8x128xf32>,
    %136 = arith.index_cast %c2_i32 : i32 to index
    %c0_60 = arith.constant 0 : index
    %c0_61 = arith.constant 0 : index
    %137 = vector.load %arg9[%136, %c0_60, %c0_61] : memref<4x8x128xf32, #tpu.memory_space<vmem>>, vector<1x8x128xf32>
    %138 = vector.shape_cast %137 : vector<1x8x128xf32> to vector<8x128xf32>
    %139 = vector.shape_cast %134 : vector<8x128xf32> to vector<1x8x128xf32>
    tpu.vector_store %arg9[%136, %c0_60, %c0_61], %139 {strides = array<i32>} : memref<4x8x128xf32, #tpu.memory_space<vmem>>, vector<1x8x128xf32>,
    %c3_i32 = arith.constant 3 : i32
    %c0_62 = arith.constant 0 : index
    %c0_63 = arith.constant 0 : index
    %140 = vector.load %arg11[%c0_62, %c0_63] : memref<8x128xf32, #tpu.memory_space<vmem>>, vector<8x128xf32>
    %141 = arith.index_cast %c3_i32 : i32 to index
    %c0_64 = arith.constant 0 : index
    %c0_65 = arith.constant 0 : index
    %142 = vector.load %arg10[%141, %c0_64, %c0_65] : memref<4x8x384xf32, #tpu.memory_space<vmem>>, vector<1x8x384xf32>
    %143 = vector.shape_cast %142 : vector<1x8x384xf32> to vector<8x384xf32>
    %cst_66 = arith.constant dense<0.000000e+00> : vector<8x384xf32>
    %144 = tpu.matmul %140, %22, %cst_66 {dimension_numbers = #tpu.dot_dimension_numbers<[1], [0], [0], [1], [0, 0, 1, 1], [], []>} : vector<8x128xf32>, vector<128x384xf32>, vector<8x384xf32> -> vector<8x384xf32>
    %145 = vector.extract_strided_slice %143 {offsets = [0, 0], sizes = [8, 128], strides = [1, 1]} : vector<8x384xf32> to vector<8x128xf32>
    %146 = vector.extract_strided_slice %144 {offsets = [0, 0], sizes = [8, 128], strides = [1, 1]} : vector<8x384xf32> to vector<8x128xf32>
    %147 = arith.addf %145, %146 : vector<8x128xf32>
    %148 = arith.negf %147 : vector<8x128xf32>
    %149 = math.exp %148 : vector<8x128xf32>
    %cst_67 = arith.constant 1.000000e+00 : f32
    %150 = vector.broadcast %cst_67 : f32 to vector<8x128xf32>
    %151 = arith.addf %150, %149 : vector<8x128xf32>
    %152 = arith.divf %150, %151 : vector<8x128xf32>
    %153 = vector.extract_strided_slice %143 {offsets = [0, 128], sizes = [8, 128], strides = [1, 1]} : vector<8x384xf32> to vector<8x128xf32>
    %154 = vector.extract_strided_slice %144 {offsets = [0, 128], sizes = [8, 128], strides = [1, 1]} : vector<8x384xf32> to vector<8x128xf32>
    %155 = arith.addf %153, %154 : vector<8x128xf32>
    %156 = arith.negf %155 : vector<8x128xf32>
    %157 = math.exp %156 : vector<8x128xf32>
    %cst_68 = arith.constant 1.000000e+00 : f32
    %158 = vector.broadcast %cst_68 : f32 to vector<8x128xf32>
    %159 = arith.addf %158, %157 : vector<8x128xf32>
    %160 = arith.divf %158, %159 : vector<8x128xf32>
    %161 = vector.extract_strided_slice %143 {offsets = [0, 256], sizes = [8, 128], strides = [1, 1]} : vector<8x384xf32> to vector<8x128xf32>
    %162 = vector.extract_strided_slice %144 {offsets = [0, 256], sizes = [8, 128], strides = [1, 1]} : vector<8x384xf32> to vector<8x128xf32>
    %163 = vector.broadcast %23 : vector<1x128xf32> to vector<8x128xf32>
    %164 = arith.addf %162, %163 : vector<8x128xf32>
    %165 = arith.mulf %152, %164 : vector<8x128xf32>
    %166 = arith.addf %161, %165 : vector<8x128xf32>
    %167 = math.tanh %166 : vector<8x128xf32>
    %cst_69 = arith.constant 1.000000e+00 : f32
    %168 = vector.broadcast %cst_69 : f32 to vector<8x128xf32>
    %169 = arith.subf %168, %160 : vector<8x128xf32>
    %170 = arith.mulf %169, %167 : vector<8x128xf32>
    %171 = arith.mulf %160, %140 : vector<8x128xf32>
    %172 = arith.addf %170, %171 : vector<8x128xf32>
    %c0_70 = arith.constant 0 : index
    %c0_71 = arith.constant 0 : index
    %173 = vector.load %arg11[%c0_70, %c0_71] : memref<8x128xf32, #tpu.memory_space<vmem>>, vector<8x128xf32>
    tpu.vector_store %arg11[%c0_70, %c0_71], %172 {strides = array<i32>} : memref<8x128xf32, #tpu.memory_space<vmem>>, vector<8x128xf32>,
    %174 = arith.index_cast %c3_i32 : i32 to index
    %c0_72 = arith.constant 0 : index
    %c0_73 = arith.constant 0 : index
    %175 = vector.load %arg9[%174, %c0_72, %c0_73] : memref<4x8x128xf32, #tpu.memory_space<vmem>>, vector<1x8x128xf32>
    %176 = vector.shape_cast %175 : vector<1x8x128xf32> to vector<8x128xf32>
    %177 = vector.shape_cast %172 : vector<8x128xf32> to vector<1x8x128xf32>
    tpu.vector_store %arg9[%174, %c0_72, %c0_73], %177 {strides = array<i32>} : memref<4x8x128xf32, #tpu.memory_space<vmem>>, vector<1x8x128xf32>,
    %c4_i32 = arith.constant 4 : i32
    return
  }
  func.func @transform_0(%arg0: i32) -> (i32, i32, i32) {
    %c0_i32 = arith.constant 0 : i32
    %c0_i32_0 = arith.constant 0 : i32
    %c0_i32_1 = arith.constant 0 : i32
    return %c0_i32, %arg0, %c0_i32_0 : i32, i32, i32
  }
  func.func @transform_1(%arg0: i32) -> (i32, i32) {
    %c0_i32 = arith.constant 0 : i32
    %c0_i32_0 = arith.constant 0 : i32
    %c0_i32_1 = arith.constant 0 : i32
    return %c0_i32, %c0_i32_0 : i32, i32
  }
  func.func @transform_2(%arg0: i32) -> (i32, i32) {
    %c0_i32 = arith.constant 0 : i32
    %c0_i32_0 = arith.constant 0 : i32
    %c0_i32_1 = arith.constant 0 : i32
    return %c0_i32, %c0_i32_0 : i32, i32
  }
  func.func @transform_3(%arg0: i32) -> (i32, i32) {
    %c0_i32 = arith.constant 0 : i32
    %c0_i32_0 = arith.constant 0 : i32
    %c0_i32_1 = arith.constant 0 : i32
    return %c0_i32, %c0_i32_0 : i32, i32
  }
  func.func @transform_4(%arg0: i32) -> (i32, i32) {
    %c0_i32 = arith.constant 0 : i32
    %c0_i32_0 = arith.constant 0 : i32
    %c0_i32_1 = arith.constant 0 : i32
    return %c0_i32, %c0_i32_0 : i32, i32
  }
  func.func @transform_5(%arg0: i32) -> (i32, i32) {
    %c0_i32 = arith.constant 0 : i32
    %c0_i32_0 = arith.constant 0 : i32
    %c0_i32_1 = arith.constant 0 : i32
    return %c0_i32, %c0_i32_0 : i32, i32
  }
  func.func @transform_6(%arg0: i32) -> (i32, i32) {
    %c0_i32 = arith.constant 0 : i32
    %c0_i32_0 = arith.constant 0 : i32
    %c0_i32_1 = arith.constant 0 : i32
    return %c0_i32, %c0_i32_0 : i32, i32
  }
  func.func @transform_7(%arg0: i32) -> (i32, i32) {
    %c0_i32 = arith.constant 0 : i32
    %c0_i32_0 = arith.constant 0 : i32
    %c0_i32_1 = arith.constant 0 : i32
    return %c0_i32, %c0_i32_0 : i32, i32
  }
  func.func @transform_8(%arg0: i32) -> (i32, i32, i32) {
    %c0_i32 = arith.constant 0 : i32
    %c0_i32_0 = arith.constant 0 : i32
    %c0_i32_1 = arith.constant 0 : i32
    return %c0_i32, %arg0, %c0_i32_0 : i32, i32, i32
  }
}

</mosaic_0001>

<bundles_post_ra>
// kernel: tpu_custom_call.1
= control target key start
LH: loop header
LB: loop body
LE: loop exit
PB: predicated region body
PF: predicated region fallthrough
CT: control target
= control target key end

     0   :  { %13 = vsyncpa [#allocation5], 0  ;;  %s2613_s0 = inlined_call_operand.hbm [shape: f32[4,8,32], index: 0, kind: input, shape index: {}]   ;;  %s2614_s1 = inlined_call_operand.hbm [shape: f32[4,16], index: 1, kind: input, shape index: {}]   ;;  %s2615_s2 = inlined_call_operand.hbm [shape: f32[16,32], index: 2, kind: input, shape index: {}]   ;;  %s2616_s3 = inlined_call_operand.vmem [shape: f32[1,32], index: 3, kind: input, shape index: {}]   ;;  %s2617_s4 = inlined_call_operand.hbm [shape: f32[32,384], index: 4, kind: input, shape index: {}]   ;;  %s2618_s5 = inlined_call_operand.hbm [shape: f32[128,384], index: 5, kind: input, shape index: {}]   ;;  %s2619_s6 = inlined_call_operand.vmem [shape: f32[1,384], index: 6, kind: input, shape index: {}]   ;;  %s2620_s7 = inlined_call_operand.vmem [shape: f32[1,128], index: 7, kind: input, shape index: {}]   ;;  %s2621_s8 = inlined_call_operand.hbm [shape: f32[4,8,128], index: 8, kind: output, shape index: {}]  }
   0x1   :  { %14 = vsyncpa [#allocation8], 0 }
   0x2   :  { %15 = vsyncpa [#allocation11], 0 }
   0x3   :  { %16 = vsyncpa [#allocation6], 0  ;;  %s2188_s27 = smov [#allocation7]   ;;  %s2189_s29 = smov [#allocation10]  }
   0x4   :  { %s35_s28 = sshll.u32 %s2188_s27, 4  ;;  %s58_s30 = sshll.u32 %s2189_s29, 4  ;;  %s36_s28 = int_to_ptr.vmem [resolvable:$true] %s35_s28  ;;  %s2247_s30 = int_to_ptr.vmem [resolvable:$true] %s58_s30 }
   0x5   :  { %s2048_s11 = scalar_lea.hbm %s2614_s1, 64 }
   0x6   :  { %p2049_p0 = scmp.ne.s32.totalorder %s2614_s1, %s2048_s11  ;;  %p2052_p1 = scmp.lt.u32.totalorder %s2048_s11, %s2614_s1 }
   0x8   :  { %p2054_p2 = pnand %p2052_p1, %p2049_p0 }
   0xa   :  { %2057 = shalt.err (!%p2054_p2)
}
   0xb   :  { %s2058_s16 = scalar_lea.vmem %s36_s28, 64  ;;  %p2063_p4 = scmp.lt.s32.totalorder %s36_s28, %s36_s28 }
   0xc   :  { %p2059_p3 = scmp.ne.s32.totalorder %s36_s28, %s2058_s16  ;;  %p2064_p5 = scmp.lt.s32.totalorder %s2058_s16, %s2058_s16 }
   0xe   :  { %p2065_p6 = por %p2064_p5, %p2063_p4 }
  0x10   :  { %p2066_p7 = pnand %p2065_p6, %p2059_p3 }
  0x12   :  { %2069 = shalt.err (!%p2066_p7)
}
  0x13   :  { %38 = dma.hbm_to_vmem [thread:$0]  %s2614_s1, 64, %s36_s28, [#allocation8]  }
  0x14   :  { %s2070_s21 = scalar_lea.hbm %s2617_s4, 1536 }
  0x15   :  { %p2071_p8 = scmp.ne.s32.totalorder %s2617_s4, %s2070_s21  ;;  %p2074_p9 = scmp.lt.u32.totalorder %s2070_s21, %s2617_s4 }
  0x17   :  { %p2076_p10 = pnand %p2074_p9, %p2071_p8 }
  0x19   :  { %2079 = shalt.err (!%p2076_p10)
}
  0x1a   :  { %s2080_s26 = scalar_lea.vmem %s2247_s30, 1536  ;;  %p2085_p12 = scmp.lt.s32.totalorder %s2247_s30, %s2247_s30 }
  0x1b   :  { %p2081_p11 = scmp.ne.s32.totalorder %s2247_s30, %s2080_s26  ;;  %p2086_p13 = scmp.lt.s32.totalorder %s2080_s26, %s2080_s26 }
  0x1d   :  { %p2087_p0 = por %p2086_p13, %p2085_p12 }
  0x1f   :  { %p2088_p1 = pnand %p2087_p0, %p2081_p11 }
  0x21   :  { %2091 = shalt.err (!%p2088_p1)
}
  0x22   :  { %s2190_s1 = smov 384   ;;  %s2191_s27 = smov 24  }
  0x23   :  { %64 = dma.hbm_to_vmem [thread:$0]  %s2617_s4, 1536, %s2247_s30, [#allocation11], %s2190_s1, %s2190_s1, %s2191_s27  }
  0x24   :  { %s2192_s9 = smov [#allocation4]   ;;  %s2092_s13 = scalar_lea.hbm %s2613_s0, 512 }
  0x25   :  { %s22_s10 = sshll.u32 %s2192_s9, 4  ;;  %p2093_p2 = scmp.ne.s32.totalorder %s2613_s0, %s2092_s13  ;;  %s23_s10 = int_to_ptr.vmem [resolvable:$true] %s22_s10 }
  0x26   :  { %p2096_p3 = scmp.lt.u32.totalorder %s2092_s13, %s2613_s0 }
  0x28   :  { %p2098_p4 = pnand %p2096_p3, %p2093_p2 }
  0x2a   :  { %2101 = shalt.err (!%p2098_p4)
}
  0x2b   :  { %s2102_s18 = scalar_lea.vmem %s23_s10, 512  ;;  %p2107_p6 = scmp.lt.s32.totalorder %s23_s10, %s23_s10 }
  0x2c   :  { %p2103_p5 = scmp.ne.s32.totalorder %s23_s10, %s2102_s18  ;;  %p2108_p7 = scmp.lt.s32.totalorder %s2102_s18, %s2102_s18 }
  0x2e   :  { %p2109_p8 = por %p2108_p7, %p2107_p6 }
  0x30   :  { %p2110_p9 = pnand %p2109_p8, %p2103_p5 }
  0x32   :  { %2113 = shalt.err (!%p2110_p9)
}
  0x33   :  { %s2193_s4 = smov 128   ;;  %s2194_s30 = smov 8  }
  0x34   :  { %28 = dma.hbm_to_vmem [thread:$0]  %s2613_s0, 512, %s23_s10, [#allocation5], %s2193_s4, %s2193_s4, %s2194_s30  }
  0x35   :  { %s2195_s21 = smov [#allocation9]   ;;  %s2196_s23 = smov [#allocation12]  }
  0x36   :  { %s44_s22 = sshll.u32 %s2195_s21, 4  ;;  %s70_s24 = sshll.u32 %s2196_s23, 4  ;;  %s45_s22 = int_to_ptr.vmem [resolvable:$true] %s44_s22  ;;  %s71_s24 = int_to_ptr.vmem [resolvable:$true] %s70_s24 }
  0x37   :  { %s2114_s28 = scalar_lea.hbm %s2615_s2, 256 }
  0x38   :  { %p2115_p10 = scmp.ne.s32.totalorder %s2615_s2, %s2114_s28  ;;  %p2118_p11 = scmp.lt.u32.totalorder %s2114_s28, %s2615_s2 }
  0x3a   :  { %p2120_p12 = pnand %p2118_p11, %p2115_p10 }
  0x3c   :  { %2123 = shalt.err (!%p2120_p12)
}
  0x3d   :  { %s2124_s0 = scalar_lea.vmem %s45_s22, 256  ;;  %p2129_p0 = scmp.lt.s32.totalorder %s45_s22, %s45_s22 }
  0x3e   :  { %p2125_p13 = scmp.ne.s32.totalorder %s45_s22, %s2124_s0  ;;  %p2130_p1 = scmp.lt.s32.totalorder %s2124_s0, %s2124_s0 }
  0x40   :  { %p2131_p2 = por %p2130_p1, %p2129_p0 }
  0x42   :  { %p2132_p3 = pnand %p2131_p2, %p2125_p13 }
  0x44   :  { %2135 = shalt.err (!%p2132_p3)
}
  0x45   :  { %50 = dma.hbm_to_vmem [thread:$0]  %s2615_s2, 256, %s45_s22, [#allocation8], %s2193_s4, %s2193_s4, %s2194_s30  }
  0x46   :  { %s2136_s16 = scalar_lea.hbm %s2618_s5, 6144 }
  0x47   :  { %p2137_p4 = scmp.ne.s32.totalorder %s2618_s5, %s2136_s16  ;;  %p2140_p5 = scmp.lt.u32.totalorder %s2136_s16, %s2618_s5 }
  0x49   :  { %p2142_p6 = pnand %p2140_p5, %p2137_p4 }
  0x4b   :  { %2145 = shalt.err (!%p2142_p6)
}
  0x4c   :  { %s2146_s21 = scalar_lea.vmem %s71_s24, 6144  ;;  %p2151_p8 = scmp.lt.s32.totalorder %s71_s24, %s71_s24 }
  0x4d   :  { %p2147_p7 = scmp.ne.s32.totalorder %s71_s24, %s2146_s21  ;;  %p2152_p9 = scmp.lt.s32.totalorder %s2146_s21, %s2146_s21 }
  0x4f   :  { %p2153_p10 = por %p2152_p9, %p2151_p8 }
  0x51   :  { %p2154_p11 = pnand %p2153_p10, %p2147_p7 }
  0x53   :  { %2157 = shalt.err (!%p2154_p11)
}
  0x54   :  { %76 = dma.hbm_to_vmem [thread:$0]  %s2618_s5, 6144, %s71_s24, [#allocation11], %s2190_s1, %s2190_s1, %s2191_s27  }
  0x55   :  { %2180 = dma.done.wait [#allocation5], 512  }
  0x56   :  { %2181 = vsyncadd [#allocation5], 4294966784 }
  0x57   :  { %2182 = dma.done.wait [#allocation8], 320  }
  0x58   :  { %2183 = vsyncadd [#allocation8], 4294966976 }
  0x59   :  { %2184 = dma.done.wait [#allocation11], 7680  }
  0x5a   :  { %2185 = vsyncadd [#allocation11], 4294959616  ;;  %v2197_v0 = vmov 0.0|0.0   ;;  %vm2198_vm0 = vmmov 0   ;;  %v2199_v1 = vmov 0.0   ;;  %v98_v2 = vld [vmem:[#allocation9] sm:$0xff] }
  0x5b   :  { %1711 = vmatprep.subr.bf16.mxu0 %v2197_v0  ;;  %1543 = vmatprep.mubr.msk.f32.mxu0 %vm2198_vm0, %v2199_v1  ;;  %v99_v3 = vld [vmem:[#allocation9 + $0x8] sm:$0xff]  ;;  %v96_v4 = vld [vmem:[#allocation7] sm:$0xf]  ;;  %v189_v7 = vld [vmem:[#allocation10 + $0x20] sm:$0xff]  ;;  %vm107_vm1 = vcmask 130048   ;;  %vm197_vm2 = vcmask 261120  }
  0x5c   :  { %274 = vmatprep.mubr.f32.mxu1 %v2199_v1  ;;  %v1712_v5 = vpack.c.bf16 %v99_v3, %v98_v2  ;;  %2006 = vtanh.f32 %v96_v4  ;;  %v186_v6 = vld [vmem:[#allocation10 + $0x8] sm:$0xff]  ;;  %v185_v8 = vld [vmem:[#allocation10] sm:$0xff]  ;;  %v188_v10 = vld [vmem:[#allocation10 + $0x18] sm:$0xff] }
  0x5d   :  { %v1714_v9 = vpack.c.bf16 %v189_v7, %v186_v6  ;;  %v192_v11 = vld [vmem:[#allocation10 + $0x38] sm:$0xff]  ;;  %v195_v12 = vld [vmem:[#allocation10 + $0x50] sm:$0xff]  ;;  %v1716_v13 = vpack.c.bf16 %v188_v10, %v185_v8  ;;  %v194_v16 = vld [vmem:[#allocation10 + $0x48] sm:$0xff] }
  0x5e   :  { %1713 = vmatpush3.bf16.msra.mxu0 %v1712_v5  ;;  %v1718_v14 = vpack.c.bf16 %v195_v12, %v192_v11  ;;  %v191_v15 = vld [vmem:[#allocation10 + $0x30] sm:$0xff]  ;;  %v190_v18 = vld [vmem:[#allocation10 + $0x28] sm:$0xff]  ;;  %v193_v21 = vld [vmem:[#allocation10 + $0x40] sm:$0xff] }
  0x5f   :  { %1715 = vmatprep.subr.bf16.mxu1 %v1714_v9  ;;  %v187_v17 = vld [vmem:[#allocation10 + $0x10] sm:$0xff]  ;;  %v1720_v19 = vpack.c.bf16 %v194_v16, %v191_v15  ;;  %v196_v22 = vld [vmem:[#allocation10 + $0x58] sm:$0xff]  ;;  %v184_v28 = vld [vmem:[#allocation4 + $0x18] sm:$0xff] }
  0x60   :  { %1717 = vmatpush1.bf16.msra.mxu1 %v1716_v13  ;;  %v1722_v20 = vpack.c.bf16 %v190_v18, %v187_v17  ;;  %v181_v23 = vld [vmem:[#allocation4] sm:$0xff]  ;;  %v1726_v24 = vpack.c.bf16 %v196_v22, %v193_v21  ;;  %v182_v26 = vld [vmem:[#allocation4 + $0x8] sm:$0xff]  ;;  %v183_v27 = vld [vmem:[#allocation4 + $0x10] sm:$0xff] }
  0x61   :  { %1719 = vmatprep.subr.bf16.mxu1 %v1718_v14  ;;  %v678_v29 = vld [vmem:[#allocation12 + $0x8] sm:$0xff]  ;;  %v681_v30 = vld [vmem:[#allocation12 + $0x20] sm:$0xff]  ;;  %v680_v33 = vld [vmem:[#allocation12 + $0x18] sm:$0xff] }
  0x62   :  { %1723 = vmatprep.subr.bf16.mxu0 %v1722_v20  ;;  %v2347_v31 = vpack.c.bf16 %v681_v30, %v678_v29  ;;  %v677_v32 = vld [vmem:[#allocation12] sm:$0xff]  ;;  %v679_v34 = vld [vmem:[#allocation12 + $0x10] sm:$0xff]  ;;  %v682_v35 = vld [vmem:[#allocation12 + $0x28] sm:$0xff] }
  0x63   :  { %v1434_v36 = vld [vmem:[%s2616_s3] ss:$0 sm:$0xff]  ;;  %v684_v37 = vld [vmem:[#allocation12 + $0x38] sm:$0xff]  ;;  %v687_v38 = vld [vmem:[#allocation12 + $0x50] sm:$0xff]  ;;  %v2353_v40 = vpack.c.bf16 %v680_v33, %v677_v32  ;;  %v2355_v42 = vpack.c.bf16 %v682_v35, %v679_v34 }
  0x64   :  { %1721 = vmatpush1.bf16.msra.mxu1 %v1720_v19  ;;  %v683_v41 = vld [vmem:[#allocation12 + $0x30] sm:$0xff]  ;;  %v2357_v45 = vpack.c.bf16 %v687_v38, %v684_v37  ;;  %v686_v46 = vld [vmem:[#allocation12 + $0x48] sm:$0xff]  ;;  %v685_v47 = vld [vmem:[#allocation12 + $0x40] sm:$0xff] }
  0x65   :  { %1738 = vmatprep.subr.bf16.mxu1 %v2197_v0  ;;  %v688_v48 = vld [vmem:[#allocation12 + $0x58] sm:$0xff]  ;;  %v690_v49 = vld [vmem:[#allocation12 + $0x68] sm:$0xff]  ;;  %v693_v50 = vld [vmem:[#allocation12 + $0x80] sm:$0xff]  ;;  %v2362_v51 = vpack.c.bf16 %v686_v46, %v683_v41 }
  0x66   :  { %v2007_v25 = vpop.eup %2006  ;;  %v689_v52 = vld [vmem:[#allocation12 + $0x60] sm:$0xff]  ;;  %v2365_v53 = vpack.c.bf16 %v688_v48, %v685_v47  ;;  %v2368_v54 = vpack.c.bf16 %v693_v50, %v690_v49  ;;  %v692_v55 = vld [vmem:[#allocation12 + $0x78] sm:$0xff]  ;;  %v691_v56 = vld [vmem:[#allocation12 + $0x70] sm:$0xff] }
  0x67   :  { %1544 = vmatmul.mubr.msk.f32.vlgmr.msra.gmra.mrb[0].mxu0 %vm107_vm1, %v2007_v25  ;;  %1436 = vmatmul.mubr.msk.f32.vlgmr.msra.gmra.mrb[0].mxu1 %vm197_vm2, %v181_v23  ;;  %v694_v57 = vld [vmem:[#allocation12 + $0x88] sm:$0xff]  ;;  %v696_v58 = vld [vmem:[#allocation12 + $0x98] sm:$0xff]  ;;  %v699_v59 = vld [vmem:[#allocation12 + $0xb0] sm:$0xff]  ;;  %v2375_v60 = vpack.c.bf16 %v692_v55, %v689_v52  ;;  %v2200_v52 = vmov 1966171168  }
  0x68   :  { %1740 = vmatpush3.bf16.msra.mxu1 %v1722_v20  ;;  %1725 = vmatpush3.bf16.msra.mxu0 %v1722_v20  ;;  %v695_v61 = vld [vmem:[#allocation12 + $0x90] sm:$0xff]  ;;  %v2378_v62 = vpack.c.bf16 %v694_v57, %v691_v56  ;;  %v2383_v2 = vpack.c.bf16 %v699_v59, %v696_v58  ;;  %v698_v3 = vld [vmem:[#allocation12 + $0xa8] sm:$0xff]  ;;  %v697_v4 = vld [vmem:[#allocation12 + $0xa0] sm:$0xff]  ;;  %v533_v55 = vunpack.c.l.s4 %v2200_v52  ;;  %v535_v56 = vlaneseq }
  0x69   :  { %280 = vmatprep.mubr.f32.mxu1 %v2199_v1  ;;  %1727 = vmatprep.subr.bf16.mxu0 %v1726_v24  ;;  %v700_v5 = vld [vmem:[#allocation12 + $0xb8] sm:$0xff]  ;;  %v702_v7 = vld [vmem:[#allocation12 + $0xc8] sm:$0xff]  ;;  %v705_v8 = vld [vmem:[#allocation12 + $0xe0] sm:$0xff] }
  0x6a   :  { %1554 = vmatprep.mubr.msk.f32.mxu0 %vm197_vm2, %v181_v23  ;;  %1741 = vmatprep.subr.bf16.mxu1 %v2197_v0  ;;  %v701_v10 = vld [vmem:[#allocation12 + $0xc0] sm:$0xff]  ;;  %v2392_v11 = vpack.c.bf16 %v700_v5, %v697_v4  ;;  %v703_v15 = vld [vmem:[#allocation12 + $0xd0] sm:$0xff]  ;;  %v706_v16 = vld [vmem:[#allocation12 + $0xe8] sm:$0xff]  ;;  %v534_v57 = vunpack.c.0.s8 %v533_v55  ;;  %v536_v58 = vshrl.u32 %v535_v56, 7 }
  0x6b   :  { %1437 = vmatmul.mubr.msk.f32.gmra.mrb[2].mxu1 %vm197_vm2, %v182_v26  ;;  %v708_v18 = vld [vmem:[#allocation12 + $0xf8] sm:$0xff]  ;;  %v707_v21 = vld [vmem:[#allocation12 + $0xf0] sm:$0xff]  ;;  %v2406_v22 = vpack.c.bf16 %v706_v16, %v703_v15  ;;  %v709_v25 = vld [vmem:[#allocation12 + $0x100] sm:$0xff] }
  0x6c   :  { %1729 = vmatpush3.bf16.msra.mxu0 %v1726_v24  ;;  %286 = vmatprep.mubr.f32.mxu1 %v2199_v1  ;;  %v713_v30 = vld [vmem:[#allocation12 + $0x120] sm:$0xff]  ;;  %v716_v34 = vld [vmem:[#allocation12 + $0x138] sm:$0xff]  ;;  %v715_v35 = vld [vmem:[#allocation12 + $0x130] sm:$0xff]  ;;  %v570_v16 = vsub.s32 1, %v536_v58 }
  0x6d   :  { %1731 = vmatprep.subr.bf16.mxu0 %v1714_v9  ;;  %1743 = vmatpush3.bf16.msra.mxu1 %v1726_v24  ;;  %v2389_v9 = vpack.c.bf16 %v698_v3, %v695_v61  ;;  %v710_v24 = vld [vmem:[#allocation12 + $0x108] sm:$0xff]  ;;  %v720_v37 = vld [vmem:[#allocation12 + $0x158] sm:$0xff]  ;;  %v723_v38 = vld [vmem:[#allocation12 + $0x170] sm:$0xff]  ;;  %v537_v3 = vsub.s32 %v534_v57, %v536_v58 }
  0x6e   :  { %1745 = vmatprep.subr.bf16.mxu1 %v2347_v31  ;;  %v2413_v29 = vpack.c.bf16 %v710_v24, %v707_v21  ;;  %v719_v41 = vld [vmem:[#allocation12 + $0x150] sm:$0xff]  ;;  %v722_v46 = vld [vmem:[#allocation12 + $0x168] sm:$0xff]  ;;  %v721_v47 = vld [vmem:[#allocation12 + $0x160] sm:$0xff]  ;;  %v574_v21 = vsub.s32 2, %v536_v58 }
  0x6f   :  { %1438 = vmatmul.mubr.msk.f32.gmra.mrb[4].mxu1 %vm197_vm2, %v183_v27  ;;  %1555 = vmatmul.mubr.msk.f32.vlgmr.msra.gmra.mrb[2].mxu0 %vm197_vm2, %v182_v26  ;;  %v712_v26 = vld [vmem:[#allocation12 + $0x118] sm:$0xff]  ;;  %v2433_v49 = vpack.c.bf16 %v722_v46, %v719_v41  ;;  %v636_v15 = vld [vmem:[%s2619_s6] sm:$0x7] }
  0x70   :  { %1733 = vmatpush1.bf16.msra.mxu0 %v1716_v13  ;;  %292 = vmatprep.mubr.f32.mxu1 %v2199_v1  ;;  %v2397_v13 = vpack.c.bf16 %v705_v8, %v702_v7  ;;  %v2416_v32 = vpack.c.bf16 %v712_v26, %v709_v25  ;;  %v724_v48 = vld [vmem:[#allocation12 + $0x178] sm:$0xff] }
  0x71   :  { %1557 = vmatprep.mubr.msk.f32.mxu0 %vm197_vm2, %v183_v27  ;;  %1735 = vmatprep.subr.bf16.mxu0 %v1718_v14  ;;  %v704_v14 = vld [vmem:[#allocation12 + $0xd8] sm:$0xff]  ;;  %v714_v27 = vld [vmem:[#allocation12 + $0x128] sm:$0xff]  ;;  %v2436_v50 = vpack.c.bf16 %v724_v48, %v721_v47 }
  0x72   :  { %v2403_v20 = vpack.c.bf16 %v704_v14, %v701_v10  ;;  %v566_v14 = vsub.s32 0, %v536_v58 }
  0x73   :  { %1439 = vmatmul.mubr.msk.f32.gmra.mrb[6].mxu1 %vm197_vm2, %v184_v28  ;;  %1558 = vmatmul.mubr.msk.f32.gmra.mrb[4].mxu0 %vm197_vm2, %v184_v28  ;;  %v717_v28 = vld [vmem:[#allocation12 + $0x140] sm:$0xff] }
  0x74   :  { %1737 = vmatpush1.bf16.msra.mxu0 %v1720_v19  ;;  %451 = vmatprep.mubr.f32.mxu0 %v2199_v1  ;;  %v711_v19 = vld [vmem:[#allocation12 + $0x110] sm:$0xff]  ;;  %v2419_v33 = vpack.c.bf16 %v717_v28, %v714_v27  ;;  %v641_v26 = vrot.slane %v636_v15, %v566_v14  ;;  %v645_v27 = vrot.slane %v636_v15, %v570_v16 }
  0x75   :  { %1568 = vmatprep.mubr.msk.f32.mxu1 %vm2198_vm0, %v2199_v1  ;;  %1776 = vmatprep.subr.bf16.mxu0 %v2197_v0  ;;  %v2409_v23 = vpack.c.bf16 %v711_v19, %v708_v18 }
 0x13a   :  { %v177_v39 = vpop.f32.mrb[0].mxu0 }
 0x13b   :  { %v178_v43 = vadd.f32 %v1434_v36, %v177_v39  ;;  %v1545_v44 = vpop.f32.mrb[1].mxu0  ;;  %v718_v36 = vld [vmem:[#allocation12 + $0x148] sm:$0xff]  ;;  %v2423_v39 = vpack.c.bf16 %v716_v34, %v713_v30  ;;  %v649_v30 = vrot.slane %v636_v15, %v574_v21 }
 0x13c   :  { %v2429_v44 = vpack.c.bf16 %v723_v38, %v720_v37 }
 0x13d   :  { %1444 = vmatmul.mubr.msk.f32.vlgmr.msra.gmra.mrb[6].mxu0 %vm197_vm2, %v178_v43  ;;  %1569 = vmatmul.mubr.msk.f32.vlgmr.msra.gmra.mrb[8].mxu1 %vm197_vm2, %v178_v43  ;;  %v2426_v43 = vpack.c.bf16 %v718_v36, %v715_v35 }
 0x13e   :  { %1747 = vmatpush1.bf16.msra.mxu1 %v2353_v40  ;;  %1778 = vmatpush3.bf16.msra.mxu0 %v2355_v42 }
 0x13f   :  { %1749 = vmatprep.subr.bf16.mxu1 %v2357_v45  ;;  %1779 = vmatprep.subr.bf16.mxu0 %v2197_v0 }
 0x140   :  { %795 = vmatprep.mubr.f32.mxu1 %v2199_v1  ;;  %1603 = vmatprep.mubr.msk.f32.mxu0 %vm2198_vm0, %v2199_v1 }
 0x142   :  { %1751 = vmatpush1.bf16.msra.mxu1 %v2362_v51  ;;  %1781 = vmatpush3.bf16.msra.mxu0 %v2365_v53  ;;  %v2380_v63 = vpop.f32.mrb[2].mxu0 }
 0x143   :  { %1753 = vmatprep.subr.bf16.mxu1 %v2368_v54  ;;  %1782 = vmatprep.subr.bf16.mxu0 %v2197_v0  ;;  %v2386_v6 = vpop.f32.mrb[3].mxu0 }
 0x146   :  { %1755 = vmatpush1.bf16.msra.mxu1 %v2375_v60  ;;  %1784 = vmatpush3.bf16.msra.mxu0 %v2378_v62  ;;  %v2394_v12 = vpop.f32.mrb[4].mxu0 }
 0x147   :  { %1757 = vmatprep.subr.bf16.mxu1 %v2383_v2  ;;  %1785 = vmatprep.subr.bf16.mxu0 %v2197_v0  ;;  %v2400_v17 = vpop.f32.mrb[5].mxu0 }
 0x14a   :  { %1759 = vmatpush1.bf16.msra.mxu1 %v2389_v9  ;;  %1787 = vmatpush3.bf16.msra.mxu0 %v2392_v11 }
 0x14b   :  { %1761 = vmatprep.subr.bf16.mxu1 %v2397_v13  ;;  %1788 = vmatprep.subr.bf16.mxu0 %v2197_v0 }
 0x14e   :  { %1763 = vmatpush1.bf16.msra.mxu1 %v2403_v20  ;;  %1790 = vmatpush3.bf16.msra.mxu0 %v2406_v22 }
 0x14f   :  { %1765 = vmatprep.subr.bf16.mxu1 %v2409_v23  ;;  %1791 = vmatprep.subr.bf16.mxu0 %v2197_v0 }
 0x152   :  { %1767 = vmatpush1.bf16.msra.mxu1 %v2413_v29  ;;  %1793 = vmatpush3.bf16.msra.mxu0 %v2416_v32 }
 0x153   :  { %1769 = vmatprep.subr.bf16.mxu1 %v2419_v33  ;;  %1794 = vmatprep.subr.bf16.mxu0 %v2197_v0 }
 0x156   :  { %1771 = vmatpush1.bf16.msra.mxu1 %v2423_v39  ;;  %1796 = vmatpush3.bf16.msra.mxu0 %v2426_v43 }
 0x157   :  { %1773 = vmatprep.subr.bf16.mxu1 %v2429_v44  ;;  %1797 = vmatprep.subr.bf16.mxu0 %v2197_v0 }
 0x15a   :  { %1775 = vmatpush1.bf16.msra.mxu1 %v2433_v49  ;;  %1799 = vmatpush3.bf16.msra.mxu0 %v2436_v50 }
 0x15b   :  { %1801 = vmatprep.subr.bf16.mxu1 %v2347_v31  ;;  %1832 = vmatprep.subr.bf16.mxu0 %v2197_v0 }
 0x15d   :  { %796 = vmatmul.mubr.f32.vlgmr.msra.gmra.mrb[0].mxu1 %v2199_v1  ;;  %1604 = vmatmul.mubr.f32.vlgmr.msra.gmra.mrb[8].mxu0 %v2199_v1 }
 0x15e   :  { %1803 = vmatpush1.bf16.msra.mxu1 %v2353_v40  ;;  %1834 = vmatpush3.bf16.msra.mxu0 %v2355_v42 }
 0x15f   :  { %1805 = vmatprep.subr.bf16.mxu1 %v2357_v45  ;;  %1835 = vmatprep.subr.bf16.mxu0 %v2197_v0 }
 0x160   :  { %971 = vmatprep.mubr.f32.mxu1 %v2199_v1  ;;  %1638 = vmatprep.mubr.msk.f32.mxu0 %vm2198_vm0, %v2199_v1 }
 0x162   :  { %1807 = vmatpush1.bf16.msra.mxu1 %v2362_v51  ;;  %1837 = vmatpush3.bf16.msra.mxu0 %v2365_v53 }
 0x163   :  { %1809 = vmatprep.subr.bf16.mxu1 %v2368_v54  ;;  %1838 = vmatprep.subr.bf16.mxu0 %v2197_v0 }
 0x166   :  { %1811 = vmatpush1.bf16.msra.mxu1 %v2375_v60  ;;  %1840 = vmatpush3.bf16.msra.mxu0 %v2378_v62 }
 0x167   :  { %1813 = vmatprep.subr.bf16.mxu1 %v2383_v2  ;;  %1841 = vmatprep.subr.bf16.mxu0 %v2197_v0 }
 0x16a   :  { %1815 = vmatpush1.bf16.msra.mxu1 %v2389_v9  ;;  %1843 = vmatpush3.bf16.msra.mxu0 %v2392_v11 }
 0x16b   :  { %1817 = vmatprep.subr.bf16.mxu1 %v2397_v13  ;;  %1844 = vmatprep.subr.bf16.mxu0 %v2197_v0 }
 0x16e   :  { %1819 = vmatpush1.bf16.msra.mxu1 %v2403_v20  ;;  %1846 = vmatpush3.bf16.msra.mxu0 %v2406_v22 }
 0x16f   :  { %1821 = vmatprep.subr.bf16.mxu1 %v2409_v23  ;;  %1847 = vmatprep.subr.bf16.mxu0 %v2197_v0 }
 0x172   :  { %1823 = vmatpush1.bf16.msra.mxu1 %v2413_v29  ;;  %1849 = vmatpush3.bf16.msra.mxu0 %v2416_v32 }
 0x173   :  { %1825 = vmatprep.subr.bf16.mxu1 %v2419_v33  ;;  %1850 = vmatprep.subr.bf16.mxu0 %v2197_v0 }
 0x176   :  { %1827 = vmatpush1.bf16.msra.mxu1 %v2423_v39  ;;  %1852 = vmatpush3.bf16.msra.mxu0 %v2426_v43 }
 0x177   :  { %1829 = vmatprep.subr.bf16.mxu1 %v2429_v44  ;;  %1853 = vmatprep.subr.bf16.mxu0 %v2197_v0 }
 0x17a   :  { %1831 = vmatpush1.bf16.msra.mxu1 %v2433_v49  ;;  %1855 = vmatpush3.bf16.msra.mxu0 %v2436_v50 }
 0x17b   :  { %1857 = vmatprep.subr.bf16.mxu1 %v2347_v31  ;;  %1888 = vmatprep.subr.bf16.mxu0 %v2197_v0 }
 0x210   :  { %v453_v59 = vpop.f32.mrb[6].mxu0  ;;  %v524_v61 = vpop.f32.mrb[8].mxu1 }
 0x211   :  { %v455_v4 = vpop.f32.mrb[7].mxu0  ;;  %v1570_v5 = vpop.f32.mrb[9].mxu1  ;;  %v545_v8 = vrot.slane %v524_v61, %v537_v3 }
 0x212   :  { %v531_v7 = vcombine.low %v453_v59, %v455_v4 }
 0x214   :  { %v538_v10 = vrot.slane %v531_v7, %v537_v3 }
 0x216   :  { %v546_v18 = vcombine.low %v538_v10, %v545_v8  ;;  %v547_v19 = vcombine.high %v538_v10, %v545_v8 }
 0x218   :  { %v554_v24 = vrot.slane %v546_v18, %v537_v3  ;;  %v561_v25 = vrot.slane %v547_v19, %v537_v3 }
 0x21a   :  { %v575_v28 = vrot.slane %v554_v24, %v574_v21  ;;  %v579_v34 = vrot.slane %v561_v25, %v566_v14  ;;  %v587_v35 = vrot.slane %v561_v25, %v574_v21  ;;  %v583_v36 = vrot.slane %v561_v25, %v570_v16 }
 0x21b   :  { %v562_v37 = vcombine.high %v554_v24, %v554_v24  ;;  %v563_v38 = vcombine.high %v561_v25, %v561_v25  ;;  %v567_v15 = vrot.slane %v554_v24, %v566_v14  ;;  %v571_v18 = vrot.slane %v554_v24, %v570_v16 }
 0x21c   :  { %v626_v41 = vadd.f32 %v575_v28, %v2386_v6  ;;  %v2485_v46 = vadd.f32 %v641_v26, %v579_v34  ;;  %v629_v47 = vadd.f32 %v2380_v63, %v587_v35  ;;  %v2488_v48 = vadd.f32 %v645_v27, %v583_v36 }
 0x21d   :  { %v591_v52 = vrot.slane %v562_v37, %v566_v14  ;;  %v599_v55 = vrot.slane %v562_v37, %v574_v21  ;;  %v595_v56 = vrot.slane %v562_v37, %v570_v16  ;;  %v603_v57 = vrot.slane %v563_v38, %v566_v14  ;;  %v2509_v14 = vld [vmem:[%s2620_s7] ss:$0 sm:$0xff]  ;;  %s2201_s7 = smov [#allocation13]  }
 0x21e   :  { %v611_v58 = vrot.slane %v563_v38, %v574_v21  ;;  %v2490_v59 = vadd.f32 %v649_v30, %v629_v47  ;;  %v607_v4 = vrot.slane %v563_v38, %v570_v16  ;;  %v1968_v19 = vadd.f32 %v641_v26, %v567_v15  ;;  %s1420_s24 = sshll.u32 %s2201_s7, 4  ;;  %s1421_s24 = int_to_ptr.vmem [resolvable:$true] %s1420_s24 }
 0x21f   :  { %v2492_v61 = vadd.f32 %v641_v26, %v591_v52  ;;  %v632_v3 = vadd.f32 %v599_v55, %v2400_v17  ;;  %v2495_v5 = vadd.f32 %v645_v27, %v595_v56  ;;  %v2497_v6 = vadd.f32 %v641_v26, %v603_v57  ;;  %s2158_s25 = scalar_lea.vmem %s1421_s24, 512  ;;  %p2163_p13 = scmp.lt.s32.totalorder %s1421_s24, %s1421_s24 }
 0x220   :  { %v635_v63 = vadd.f32 %v2394_v12, %v611_v58  ;;  %v2502_v8 = vadd.f32 %v645_v27, %v607_v4  ;;  %v1970_v25 = vadd.f32 %v645_v27, %v571_v18  ;;  %v655_v27 = vadd.f32 %v649_v30, %v626_v41  ;;  %p2159_p12 = scmp.ne.s32.totalorder %s1421_s24, %s2158_s25  ;;  %p2164_p0 = scmp.lt.s32.totalorder %s2158_s25, %s2158_s25 }
 0x221   :  { %v2500_v7 = vadd.f32 %v649_v30, %v632_v3 }
 0x222   :  { %v2504_v10 = vadd.f32 %v649_v30, %v635_v63  ;;  %p2165_p1 = por %p2164_p0, %p2163_p13 }
 0x224   :  { %p2166_p2 = pnand %p2165_p1, %p2159_p12 }
 0x230   :  { %v797_v21 = vpop.f32.mrb[0].mxu1  ;;  %v868_v28 = vpop.f32.mrb[8].mxu0 }
 0x231   :  { %v1969_v17 = vadd.f32 %v1968_v19, %v797_v21  ;;  %v799_v34 = vpop.f32.mrb[1].mxu1  ;;  %v1605_v35 = vpop.f32.mrb[9].mxu0  ;;  %v892_v24 = vadd.f32 %v2509_v14, %v868_v28 }
 0x232   :  { %v1971_v36 = vadd.f32 %v1970_v25, %v799_v34 }
 0x233   :  { %v1446_v37 = vmul.f32 -1.442695, %v1969_v17 }
 0x234   :  { %v1447_v38 = vmul.f32 -1.442695, %v1971_v36 }
 0x235   :  { %2008 = vpow2.f32 %v1446_v37 }
 0x236   :  { %2010 = vpow2.f32 %v1447_v38 }
 0x23f   :  { %v2009_v12 = vpop.eup %2008 }
 0x240   :  { %v876_v47 = vadd.f32 1.0, %v2009_v12  ;;  %v2011_v52 = vpop.eup %2010 }
 0x241   :  { %v883_v16 = vadd.f32 1.0, %v2011_v52 }
 0x242   :  { %2012 = vrcp.f32 %v876_v47 }
 0x243   :  { %2014 = vrcp.f32 %v883_v16 }
 0x24c   :  { %v2013_v26 = vpop.eup %2012 }
 0x24d   :  { %v893_v55 = vmul.f32 %v2013_v26, %v892_v24  ;;  %v2015_v57 = vpop.eup %2014 }
 0x24e   :  { %v896_v58 = vsub.f32 1.0, %v2015_v57  ;;  %v898_v63 = vmul.f32 0.0, %v2015_v57 }
 0x24f   :  { %v894_v56 = vadd.f32 %v893_v55, %v655_v27 }
 0x251   :  { %2016 = vtanh.f32 %v894_v56 }
 0x25b   :  { %v2017_v3 = vpop.eup %2016 }
 0x25c   :  { %v897_v4 = vmul.f32 %v2017_v3, %v896_v58 }
 0x25e   :  { %v2512_v15 = vadd.f32 %v898_v63, %v897_v4 }
 0x260   :  { %972 = vmatmul.mubr.f32.vlgmr.msra.gmra.mrb[2].mxu1 %v2512_v15  ;;  %901 = vst [vmem:[#allocation13] sm:$0xff] %v2512_v15  ;;  %1639 = vmatmul.mubr.f32.vlgmr.msra.gmra.mrb[10].mxu0 %v2512_v15 }
 0x261   :  { %1859 = vmatpush1.bf16.msra.mxu1 %v2353_v40  ;;  %1890 = vmatpush3.bf16.msra.mxu0 %v2355_v42 }
 0x262   :  { %1861 = vmatprep.subr.bf16.mxu1 %v2357_v45  ;;  %1891 = vmatprep.subr.bf16.mxu0 %v2197_v0 }
 0x263   :  { %1142 = vmatprep.mubr.f32.mxu1 %v2199_v1  ;;  %1673 = vmatprep.mubr.msk.f32.mxu0 %vm2198_vm0, %v2199_v1 }
 0x265   :  { %1863 = vmatpush1.bf16.msra.mxu1 %v2362_v51  ;;  %1893 = vmatpush3.bf16.msra.mxu0 %v2365_v53 }
 0x266   :  { %1865 = vmatprep.subr.bf16.mxu1 %v2368_v54  ;;  %1894 = vmatprep.subr.bf16.mxu0 %v2197_v0 }
 0x269   :  { %1867 = vmatpush1.bf16.msra.mxu1 %v2375_v60  ;;  %1896 = vmatpush3.bf16.msra.mxu0 %v2378_v62 }
 0x26a   :  { %1869 = vmatprep.subr.bf16.mxu1 %v2383_v2  ;;  %1897 = vmatprep.subr.bf16.mxu0 %v2197_v0 }
 0x26d   :  { %1871 = vmatpush1.bf16.msra.mxu1 %v2389_v9  ;;  %1899 = vmatpush3.bf16.msra.mxu0 %v2392_v11 }
 0x26e   :  { %1873 = vmatprep.subr.bf16.mxu1 %v2397_v13  ;;  %1900 = vmatprep.subr.bf16.mxu0 %v2197_v0 }
 0x271   :  { %1875 = vmatpush1.bf16.msra.mxu1 %v2403_v20  ;;  %1902 = vmatpush3.bf16.msra.mxu0 %v2406_v22 }
 0x272   :  { %1877 = vmatprep.subr.bf16.mxu1 %v2409_v23  ;;  %1903 = vmatprep.subr.bf16.mxu0 %v2197_v0 }
 0x275   :  { %1879 = vmatpush1.bf16.msra.mxu1 %v2413_v29  ;;  %1905 = vmatpush3.bf16.msra.mxu0 %v2416_v32 }
 0x276   :  { %1881 = vmatprep.subr.bf16.mxu1 %v2419_v33  ;;  %1906 = vmatprep.subr.bf16.mxu0 %v2197_v0 }
 0x279   :  { %1883 = vmatpush1.bf16.msra.mxu1 %v2423_v39  ;;  %1908 = vmatpush3.bf16.msra.mxu0 %v2426_v43 }
 0x27a   :  { %1885 = vmatprep.subr.bf16.mxu1 %v2429_v44  ;;  %1909 = vmatprep.subr.bf16.mxu0 %v2197_v0 }
 0x27d   :  { %1887 = vmatpush1.bf16.msra.mxu1 %v2433_v49  ;;  %1911 = vmatpush3.bf16.msra.mxu0 %v2436_v50 }
 0x27e   :  { %1913 = vmatprep.subr.bf16.mxu1 %v2347_v31  ;;  %1944 = vmatprep.subr.bf16.mxu0 %v2197_v0 }
 0x333   :  { %v973_v30 = vpop.f32.mrb[2].mxu1  ;;  %v1044_v41 = vpop.f32.mrb[10].mxu0 }
 0x334   :  { %v1973_v18 = vadd.f32 %v2485_v46, %v973_v30  ;;  %v975_v19 = vpop.f32.mrb[3].mxu1  ;;  %v1640_v21 = vpop.f32.mrb[11].mxu0  ;;  %v1062_v31 = vadd.f32 %v2509_v14, %v1044_v41 }
 0x335   :  { %v1975_v25 = vadd.f32 %v2488_v48, %v975_v19 }
 0x336   :  { %v1449_v28 = vmul.f32 -1.442695, %v1973_v18 }
 0x337   :  { %v1450_v17 = vmul.f32 -1.442695, %v1975_v25 }
 0x338   :  { %2018 = vpow2.f32 %v1449_v28 }
 0x339   :  { %2020 = vpow2.f32 %v1450_v17 }
 0x342   :  { %v2019_v34 = vpop.eup %2018 }
 0x343   :  { %v1052_v35 = vadd.f32 1.0, %v2019_v34  ;;  %v2021_v36 = vpop.eup %2020 }
 0x344   :  { %v1059_v37 = vadd.f32 1.0, %v2021_v36 }
 0x345   :  { %2022 = vrcp.f32 %v1052_v35 }
 0x346   :  { %2024 = vrcp.f32 %v1059_v37 }
 0x34f   :  { %v2023_v38 = vpop.eup %2022 }
 0x350   :  { %v1063_v12 = vmul.f32 %v2023_v38, %v1062_v31  ;;  %v2025_v47 = vpop.eup %2024 }
 0x351   :  { %v1066_v52 = vsub.f32 1.0, %v2025_v47  ;;  %v1068_v24 = vmul.f32 %v2025_v47, %v2512_v15 }
 0x352   :  { %v1064_v46 = vadd.f32 %v1063_v12, %v2490_v59 }
 0x354   :  { %2026 = vtanh.f32 %v1064_v46 }
 0x35e   :  { %v2027_v48 = vpop.eup %2026 }
 0x35f   :  { %v1067_v16 = vmul.f32 %v2027_v48, %v1066_v52 }
 0x361   :  { %v1069_v26 = vadd.f32 %v1068_v24, %v1067_v16 }
 0x363   :  { %1143 = vmatmul.mubr.f32.vlgmr.msra.gmra.mrb[4].mxu1 %v1069_v26  ;;  %1072 = vst [vmem:[#allocation13 + $0x8] sm:$0xff] %v1069_v26  ;;  %1674 = vmatmul.mubr.f32.vlgmr.msra.gmra.mrb[12].mxu0 %v1069_v26 }
 0x364   :  { %1915 = vmatpush1.bf16.msra.mxu1 %v2353_v40  ;;  %1946 = vmatpush3.bf16.msra.mxu0 %v2355_v42 }
 0x365   :  { %1917 = vmatprep.subr.bf16.mxu1 %v2357_v45  ;;  %1947 = vmatprep.subr.bf16.mxu0 %v2197_v0 }
 0x366   :  { %1313 = vmatprep.mubr.f32.mxu1 %v2199_v1  ;;  %1708 = vmatprep.mubr.msk.f32.mxu0 %vm2198_vm0, %v2199_v1 }
 0x368   :  { %1919 = vmatpush1.bf16.msra.mxu1 %v2362_v51  ;;  %1949 = vmatpush3.bf16.msra.mxu0 %v2365_v53 }
 0x369   :  { %1921 = vmatprep.subr.bf16.mxu1 %v2368_v54  ;;  %1950 = vmatprep.subr.bf16.mxu0 %v2197_v0 }
 0x36c   :  { %1923 = vmatpush1.bf16.msra.mxu1 %v2375_v60  ;;  %1952 = vmatpush3.bf16.msra.mxu0 %v2378_v62 }
 0x36d   :  { %1925 = vmatprep.subr.bf16.mxu1 %v2383_v2  ;;  %1953 = vmatprep.subr.bf16.mxu0 %v2197_v0 }
 0x370   :  { %1927 = vmatpush1.bf16.msra.mxu1 %v2389_v9  ;;  %1955 = vmatpush3.bf16.msra.mxu0 %v2392_v11 }
 0x371   :  { %1929 = vmatprep.subr.bf16.mxu1 %v2397_v13  ;;  %1956 = vmatprep.subr.bf16.mxu0 %v2197_v0 }
 0x374   :  { %1931 = vmatpush1.bf16.msra.mxu1 %v2403_v20  ;;  %1958 = vmatpush3.bf16.msra.mxu0 %v2406_v22 }
 0x375   :  { %1933 = vmatprep.subr.bf16.mxu1 %v2409_v23  ;;  %1959 = vmatprep.subr.bf16.mxu0 %v2197_v0 }
 0x378   :  { %1935 = vmatpush1.bf16.msra.mxu1 %v2413_v29  ;;  %1961 = vmatpush3.bf16.msra.mxu0 %v2416_v32 }
 0x379   :  { %1937 = vmatprep.subr.bf16.mxu1 %v2419_v33  ;;  %1962 = vmatprep.subr.bf16.mxu0 %v2197_v0 }
 0x37c   :  { %1939 = vmatpush1.bf16.msra.mxu1 %v2423_v39  ;;  %1964 = vmatpush3.bf16.msra.mxu0 %v2426_v43 }
 0x37d   :  { %1941 = vmatprep.subr.bf16.mxu1 %v2429_v44  ;;  %1965 = vmatprep.subr.bf16.mxu0 %v2197_v0 }
 0x380   :  { %1943 = vmatpush1.bf16.msra.mxu1 %v2433_v49  ;;  %1967 = vmatpush3.bf16.msra.mxu0 %v2436_v50 }
 0x436   :  { %v1144_v1 = vpop.f32.mrb[4].mxu1  ;;  %v1215_v40 = vpop.f32.mrb[12].mxu0 }
 0x437   :  { %v1977_v42 = vadd.f32 %v2492_v61, %v1144_v1  ;;  %v1146_v45 = vpop.f32.mrb[5].mxu1  ;;  %v1675_v51 = vpop.f32.mrb[13].mxu0  ;;  %v1233_v11 = vadd.f32 %v2509_v14, %v1215_v40 }
 0x438   :  { %v1979_v53 = vadd.f32 %v2495_v5, %v1146_v45 }
 0x439   :  { %v1451_v54 = vmul.f32 -1.442695, %v1977_v42 }
 0x43a   :  { %v1452_v60 = vmul.f32 -1.442695, %v1979_v53 }
 0x43b   :  { %2028 = vpow2.f32 %v1451_v54 }
 0x43c   :  { %2030 = vpow2.f32 %v1452_v60 }
 0x445   :  { %v2029_v62 = vpop.eup %2028 }
 0x446   :  { %v1223_v2 = vadd.f32 1.0, %v2029_v62  ;;  %v2031_v0 = vpop.eup %2030 }
 0x447   :  { %v1230_v9 = vadd.f32 1.0, %v2031_v0 }
 0x448   :  { %2032 = vrcp.f32 %v1223_v2 }
 0x449   :  { %2034 = vrcp.f32 %v1230_v9 }
 0x452   :  { %v2033_v13 = vpop.eup %2032 }
 0x453   :  { %v1234_v20 = vmul.f32 %v2033_v13, %v1233_v11  ;;  %v2035_v23 = vpop.eup %2034 }
 0x454   :  { %v1237_v29 = vsub.f32 1.0, %v2035_v23  ;;  %v1239_v39 = vmul.f32 %v2035_v23, %v1069_v26 }
 0x455   :  { %v1235_v22 = vadd.f32 %v1234_v20, %v2500_v7 }
 0x457   :  { %2036 = vtanh.f32 %v1235_v22 }
 0x461   :  { %v2037_v32 = vpop.eup %2036 }
 0x462   :  { %v1238_v33 = vmul.f32 %v2037_v32, %v1237_v29 }
 0x464   :  { %v1240_v43 = vadd.f32 %v1239_v39, %v1238_v33 }
 0x466   :  { %1314 = vmatmul.mubr.f32.vlgmr.msra.gmra.mrb[6].mxu1 %v1240_v43  ;;  %1243 = vst [vmem:[#allocation13 + $0x10] sm:$0xff] %v1240_v43  ;;  %1709 = vmatmul.mubr.f32.vlgmr.msra.gmra.mrb[14].mxu0 %v1240_v43 }
 0x539   :  { %v1315_v44 = vpop.f32.mrb[6].mxu1  ;;  %v1386_v49 = vpop.f32.mrb[14].mxu0 }
 0x53a   :  { %v1981_v50 = vadd.f32 %v2497_v6, %v1315_v44  ;;  %v1317_v59 = vpop.f32.mrb[7].mxu1  ;;  %v1710_v61 = vpop.f32.mrb[15].mxu0  ;;  %v1404_v3 = vadd.f32 %v2509_v14, %v1386_v49 }
 0x53b   :  { %v1983_v5 = vadd.f32 %v2502_v8, %v1317_v59 }
 0x53c   :  { %v1453_v27 = vmul.f32 -1.442695, %v1981_v50 }
 0x53d   :  { %v1454_v7 = vmul.f32 -1.442695, %v1983_v5 }
 0x53e   :  { %2038 = vpow2.f32 %v1453_v27 }
 0x53f   :  { %2040 = vpow2.f32 %v1454_v7 }
 0x548   :  { %v2039_v55 = vpop.eup %2038 }
 0x549   :  { %v1394_v56 = vadd.f32 1.0, %v2039_v55  ;;  %v2041_v57 = vpop.eup %2040 }
 0x54a   :  { %v1401_v58 = vadd.f32 1.0, %v2041_v57 }
 0x54b   :  { %2042 = vrcp.f32 %v1394_v56 }
 0x54c   :  { %2044 = vrcp.f32 %v1401_v58 }
 0x555   :  { %v2043_v4 = vpop.eup %2042 }
 0x556   :  { %v1405_v63 = vmul.f32 %v2043_v4, %v1404_v3  ;;  %v2045_v15 = vpop.eup %2044 }
 0x557   :  { %v1408_v30 = vsub.f32 1.0, %v2045_v15  ;;  %v1410_v18 = vmul.f32 %v2045_v15, %v1240_v43 }
 0x558   :  { %v1406_v6 = vadd.f32 %v1405_v63, %v2504_v10 }
 0x55a   :  { %2046 = vtanh.f32 %v1406_v6 }
 0x564   :  { %v2047_v8 = vpop.eup %2046 }
 0x565   :  { %v1409_v41 = vmul.f32 %v2047_v8, %v1408_v30 }
 0x567   :  { %v1411_v19 = vadd.f32 %v1410_v18, %v1409_v41 }
 0x569   :  { %1414 = vst [vmem:[#allocation13 + $0x18] sm:$0xff] %v1411_v19 }
 0x56a   :  { %2169 = shalt.err (!%p2166_p2)
}
 0x56b   :  { %s2170_s29 = scalar_lea.hbm %s2621_s8, 512 }
 0x56c   :  { %p2171_p3 = scmp.ne.s32.totalorder %s2621_s8, %s2170_s29  ;;  %p2174_p4 = scmp.lt.u32.totalorder %s2170_s29, %s2621_s8 }
 0x56e   :  { %p2176_p5 = pnand %p2174_p4, %p2171_p3 }
 0x570   :  { %2179 = shalt.err (!%p2176_p5)
}
 0x571   :  { %1426 = dma.vmem_to_hbm [thread:$0]  %s1421_s24, 512, %s2621_s8, [#allocation6], %s2193_s4, %s2193_s4, %s2194_s30  }
 0x572   :  { %2186 = dma.done.wait [#allocation6], 512  }
 0x573   :  { %2187 = vsyncadd [#allocation6], 4294966784 }
 0x574   :  { %1430 = vsyncpa [#allocation5], 1 }
 0x575   :  { %1431 = vsyncpa [#allocation8], 1 }
 0x576   :  { %1432 = vsyncpa [#allocation11], 1 }
 0x577   :  { %1433 = vsyncpa [#allocation6], 1 }

</bundles_post_ra>
